<compile_context>
chip_gen: v6e
topology: v6e:2x2x1
jax: 0.10.0
libtpu: 0.0.40
codegen_flags: <defaults>
</compile_context>

<pallas_src>
import functools

import jax
import jax.numpy as jnp
import numpy as np
from jax.experimental import pallas as pl
from jax.experimental.pallas import tpu as pltpu


def _gconv_meta_kernel(alpha_ref, meta_ref, emb_ref, w_ref, fcb_ref, bias_ref,
                       *rest, training):
    """Grid = (row_tiles, k_tiles).  Per (i, k) step:
         h    = dropout(emb[k_tile]) @ W + b_fc     (bf16 MXU, f32 accumulate)
         acc += meta[i_tile, k_tile] @ h
       Last k: out = PReLU(dropout(acc + bias))."""
    if training:
        demb_ref, dout_ref, out_ref, acc_ref = rest
    else:
        out_ref, acc_ref = rest

    k = pl.program_id(1)

    @pl.when(k == 0)
    def _init():
        acc_ref[...] = jnp.zeros_like(acc_ref)

    e = emb_ref[...]
    if training:
        e = e * demb_ref[...]                       # fused dropout(emb, 0.3)

    h = jnp.dot(e.astype(jnp.bfloat16), w_ref[...],
                preferred_element_type=jnp.float32)
    h = h + fcb_ref[...]                            # Linear bias

    acc_ref[...] += jnp.dot(meta_ref[...], h.astype(jnp.bfloat16),
                            preferred_element_type=jnp.float32)

    @pl.when(k == pl.num_programs(1) - 1)
    def _finalize():
        out = acc_ref[...] + bias_ref[...]          # extra 0.001 bias
        if training:
            out = out * dout_ref[...]               # fused dropout(out, 0.8)
        alpha = alpha_ref[0]                        # shared PReLU alpha (SMEM)
        out_ref[...] = jnp.where(out >= 0.0, out, alpha * out)


def _pad2d(x, rows, cols, dtype):
    x = x.astype(dtype)
    return jnp.pad(x, ((0, rows - x.shape[0]), (0, cols - x.shape[1])))


def gconv_meta_forward(emb, meta, w, fc_b, bias, alpha, *,
                       drop_in=0.3, drop_out=0.8, training=True, rng_key=None,
                       tile_m=128, tile_k=128):
    """emb: [N, C_in] f32, meta: [N, N] f32 (dense adjacency),
       w: [C_in, C_out] (transpose of torch Linear.weight),
       fc_b/bias: [C_out] f32, alpha: [1] f32."""
    n, c_in = emb.shape
    c_out = w.shape[1]

    # Lane-dense feature axis (multiple of 128) and tile-aligned node axis.
    c_pad = max(128, -(-c_out // 128) * 128)
    n_pad_m = pl.cdiv(n, tile_m) * tile_m           # rows of meta / out
    n_pad_k = pl.cdiv(n, tile_k) * tile_k           # cols of meta / rows of emb
    grid_m, grid_k = n_pad_m // tile_m, n_pad_k // tile_k

    meta_p = _pad2d(meta, n_pad_m, n_pad_k, jnp.bfloat16)
    emb_p = _pad2d(emb, n_pad_k, c_in, jnp.float32)
    w_p = _pad2d(w, c_in, c_pad, jnp.bfloat16)
    fcb_p = _pad2d(jnp.reshape(fc_b, (1, -1)), 1, c_pad, jnp.float32)
    bias_p = _pad2d(jnp.reshape(bias, (1, -1)), 1, c_pad, jnp.float32)
    alpha_p = jnp.reshape(jnp.asarray(alpha, jnp.float32), (1,))

    in_specs = [
        pl.BlockSpec((tile_m, tile_k), lambda i, k, a: (i, k)),    # meta tile
        pl.BlockSpec((tile_k, c_in), lambda i, k, a: (k, 0)),      # emb rows
        pl.BlockSpec((c_in, c_pad), lambda i, k, a: (0, 0)),       # W (resident)
        pl.BlockSpec((1, c_pad), lambda i, k, a: (0, 0)),          # fc bias
        pl.BlockSpec((1, c_pad), lambda i, k, a: (0, 0)),          # extra bias
    ]
    inputs = [meta_p, emb_p, w_p, fcb_p, bias_p]

    if training:
        if rng_key is None:
            rng_key = jax.random.PRNGKey(0)
        k1, k2 = jax.random.split(rng_key)
        keep_in, keep_out = 1.0 - drop_in, 1.0 - drop_out
        demb_p = (jax.random.bernoulli(k1, keep_in, (n_pad_k, c_in))
                  .astype(jnp.float32) / keep_in)
        dout_p = (jax.random.bernoulli(k2, keep_out, (n_pad_m, c_pad))
                  .astype(jnp.float32) / keep_out)
        in_specs += [
            pl.BlockSpec((tile_k, c_in), lambda i, k, a: (k, 0)),   # emb mask
            pl.BlockSpec((tile_m, c_pad), lambda i, k, a: (i, 0)),  # out mask
        ]
        inputs += [demb_p, dout_p]

    # VMEM budget: double-buffered tiles + resident params + f32 accumulator.
    per_step = (tile_m * tile_k * 2 + tile_k * c_in * 4 + c_in * c_pad * 2
                + 2 * c_pad * 4 + 2 * tile_m * c_pad * 4)
    if training:
        per_step += tile_k * c_in * 4 + tile_m * c_pad * 4
    vmem_limit = int(min(max(4 * per_step + (4 << 20), 8 << 20), 48 << 20))

    flops = 2 * grid_m * n_pad_k * c_in * c_pad + 2 * n_pad_m * n_pad_k * c_pad
    bytes_accessed = (n_pad_m * n_pad_k * 2 + grid_m * n_pad_k * c_in * 4
                      + n_pad_m * c_pad * 4 + c_in * c_pad * 2)
    if training:
        bytes_accessed += grid_m * n_pad_k * c_in * 4 + n_pad_m * c_pad * 4

    out_p = pl.pallas_call(
        functools.partial(_gconv_meta_kernel, training=training),
        out_shape=jax.ShapeDtypeStruct((n_pad_m, c_pad), jnp.float32),
        grid_spec=pltpu.PrefetchScalarGridSpec(
            num_scalar_prefetch=1,                  # alpha -> SMEM
            grid=(grid_m, grid_k),
            in_specs=in_specs,
            out_specs=pl.BlockSpec((tile_m, c_pad), lambda i, k, a: (i, 0)),
            scratch_shapes=[pltpu.VMEM((tile_m, c_pad), jnp.float32)],
        ),
        compiler_params=pltpu.CompilerParams(
            dimension_semantics=("parallel", "arbitrary"),
            vmem_limit_bytes=vmem_limit),
        cost_estimate=pl.CostEstimate(flops=int(flops), transcendentals=0,
                                      bytes_accessed=int(bytes_accessed)),
    )(alpha_p, *inputs)

    return out_p[:n, :c_out]


if __name__ == "__main__":
    # Small shapes consistent with the module: N graph nodes, C_in -> C_out.
    N, C_IN, C_OUT = 256, 32, 16

    key = jax.random.PRNGKey(0)
    k_emb, k_meta, k_w, k_drop = jax.random.split(key, 4)

    emb = jax.random.normal(k_emb, (N, C_IN), dtype=jnp.float32)
    # dense stand-in for the sparse adjacency used by torch.spmm
    meta = (jax.random.uniform(k_meta, (N, N)) > 0.7).astype(jnp.float32) / N

    # Parameters initialized exactly as in __init__ / weight_init:
    #   Linear.weight: xavier_normal_(gain=1.414), Linear.bias: 0.0,
    #   extra bias: 0.001, PReLU alpha: 0.25 (torch default).
    xavier_std = 1.414 * np.sqrt(2.0 / (C_IN + C_OUT))
    w = jax.random.normal(k_w, (C_IN, C_OUT), dtype=jnp.float32) * xavier_std
    fc_b = jnp.zeros((C_OUT,), dtype=jnp.float32)
    bias = jnp.full((C_OUT,), 0.001, dtype=jnp.float32)
    alpha = jnp.array([0.25], dtype=jnp.float32)

    # Eval-mode run (dropout disabled) -> compare against a pure-JAX f32
    # reference (kernel matmuls are bf16, hence the loose tolerance).
    out_eval = gconv_meta_forward(emb, meta, w, fc_b, bias, alpha,
                                  training=False)
    jax.block_until_ready(out_eval)

    h_ref = emb @ w + fc_b[None, :]
    ref = meta @ h_ref + bias[None, :]
    ref = jnp.where(ref >= 0.0, ref, 0.25 * ref)
    np.testing.assert_allclose(np.asarray(out_eval), np.asarray(ref),
                               rtol=2e-2, atol=2e-2)

    # Training-mode run: both dropouts active (stochastic masks from
    # jax.random, fused into the kernel as elementwise scale-masks),
    # matching the torch module's default training-time behavior.
    out_train = gconv_meta_forward(emb, meta, w, fc_b, bias, alpha,
                                   training=True, rng_key=k_drop)
    jax.block_until_ready(out_train)
    assert out_train.shape == (N, C_OUT)

    print("KERNEL_OK")
</pallas_src>

<mosaic_0001>
module attributes {stable_mosaic.version = 11 : i64} {
  func.func @_gconv_meta_kernel(%arg0: i32, %arg1: i32, %arg2: memref<1xf32, #tpu.memory_space<smem>>, %arg3: memref<128x128xbf16, #tpu.memory_space<vmem>>, %arg4: memref<128x32xf32, #tpu.memory_space<vmem>>, %arg5: memref<32x128xbf16, #tpu.memory_space<vmem>>, %arg6: memref<1x128xf32, #tpu.memory_space<vmem>>, %arg7: memref<1x128xf32, #tpu.memory_space<vmem>>, %arg8: memref<128x128xf32, #tpu.memory_space<vmem>>, %arg9: memref<128x128xf32, #tpu.memory_space<vmem>>) attributes {dimension_semantics = [#tpu.dimension_semantics<parallel>, #tpu.dimension_semantics<arbitrary>], iteration_bounds = array<i64: 2, 2>, scalar_prefetch = 1 : i64, scratch_operands = 1 : i64, tpu.core_type = #tpu.core_type<tc>, window_params = [{transform_indices = @transform_0, window_bounds = array<i64: 128, 128>}, {transform_indices = @transform_1, window_bounds = array<i64: 128, 32>}, {pipeline_mode = #tpu.pipeline_mode<synchronous>, transform_indices = @transform_2, window_bounds = array<i64: 32, 128>}, {pipeline_mode = #tpu.pipeline_mode<synchronous>, transform_indices = @transform_3, window_bounds = array<i64: 1, 128>}, {pipeline_mode = #tpu.pipeline_mode<synchronous>, transform_indices = @transform_4, window_bounds = array<i64: 1, 128>}, {transform_indices = @transform_5, window_bounds = array<i64: 128, 128>}]} {
    %c0_i32 = arith.constant 0 : i32
    %0 = arith.cmpi eq, %arg1, %c0_i32 : i32
    %1 = arith.extui %0 : i1 to i32
    %c0_i32_0 = arith.constant 0 : i32
    %2 = arith.cmpi ne, %1, %c0_i32_0 : i32
    scf.if %2 {
      %cst_14 = arith.constant 0.000000e+00 : f32
      %19 = vector.broadcast %cst_14 : f32 to vector<128x128xf32>
      %c0_15 = arith.constant 0 : index
      %c0_16 = arith.constant 0 : index
      %20 = vector.load %arg9[%c0_15, %c0_16] : memref<128x128xf32, #tpu.memory_space<vmem>>, vector<128x128xf32>
      tpu.vector_store %arg9[%c0_15, %c0_16], %19 {strides = array<i32>} : memref<128x128xf32, #tpu.memory_space<vmem>>, vector<128x128xf32>,
    } else {
    }
    %c0 = arith.constant 0 : index
    %c0_1 = arith.constant 0 : index
    %3 = vector.load %arg4[%c0, %c0_1] : memref<128x32xf32, #tpu.memory_space<vmem>>, vector<128x32xf32>
    %4 = arith.truncf %3 : vector<128x32xf32> to vector<128x32xbf16>
    %c0_2 = arith.constant 0 : index
    %c0_3 = arith.constant 0 : index
    %5 = vector.load %arg5[%c0_2, %c0_3] : memref<32x128xbf16, #tpu.memory_space<vmem>>, vector<32x128xbf16>
    %cst = arith.constant dense<0.000000e+00> : vector<128x128xf32>
    %6 = tpu.matmul %4, %5, %cst {dimension_numbers = #tpu.dot_dimension_numbers<[1], [0], [0], [1], [0, 0, 1, 1], [], []>} : vector<128x32xbf16>, vector<32x128xbf16>, vector<128x128xf32> -> vector<128x128xf32>
    %c0_4 = arith.constant 0 : index
    %c0_5 = arith.constant 0 : index
    %7 = vector.load %arg6[%c0_4, %c0_5] : memref<1x128xf32, #tpu.memory_space<vmem>>, vector<1x128xf32>
    %8 = vector.broadcast %7 : vector<1x128xf32> to vector<128x128xf32>
    %9 = arith.addf %6, %8 : vector<128x128xf32>
    %c0_6 = arith.constant 0 : index
    %c0_7 = arith.constant 0 : index
    %10 = vector.load %arg9[%c0_6, %c0_7] : memref<128x128xf32, #tpu.memory_space<vmem>>, vector<128x128xf32>
    %c0_8 = arith.constant 0 : index
    %c0_9 = arith.constant 0 : index
    %11 = vector.load %arg3[%c0_8, %c0_9] : memref<128x128xbf16, #tpu.memory_space<vmem>>, vector<128x128xbf16>
    %12 = arith.truncf %9 : vector<128x128xf32> to vector<128x128xbf16>
    %cst_10 = arith.constant dense<0.000000e+00> : vector<128x128xf32>
    %13 = tpu.matmul %11, %12, %cst_10 {dimension_numbers = #tpu.dot_dimension_numbers<[1], [0], [0], [1], [0, 0, 1, 1], [], []>} : vector<128x128xbf16>, vector<128x128xbf16>, vector<128x128xf32> -> vector<128x128xf32>
    %14 = arith.addf %10, %13 : vector<128x128xf32>
    %c0_11 = arith.constant 0 : index
    %c0_12 = arith.constant 0 : index
    %15 = vector.load %arg9[%c0_11, %c0_12] : memref<128x128xf32, #tpu.memory_space<vmem>>, vector<128x128xf32>
    tpu.vector_store %arg9[%c0_11, %c0_12], %14 {strides = array<i32>} : memref<128x128xf32, #tpu.memory_space<vmem>>, vector<128x128xf32>,
    %c1_i32 = arith.constant 1 : i32
    %16 = arith.cmpi eq, %arg1, %c1_i32 : i32
    %17 = arith.extui %16 : i1 to i32
    %c0_i32_13 = arith.constant 0 : i32
    %18 = arith.cmpi ne, %17, %c0_i32_13 : i32
    scf.if %18 {
      %c0_14 = arith.constant 0 : index
      %c0_15 = arith.constant 0 : index
      %19 = vector.load %arg9[%c0_14, %c0_15] : memref<128x128xf32, #tpu.memory_space<vmem>>, vector<128x128xf32>
      %c0_16 = arith.constant 0 : index
      %c0_17 = arith.constant 0 : index
      %20 = vector.load %arg7[%c0_16, %c0_17] : memref<1x128xf32, #tpu.memory_space<vmem>>, vector<1x128xf32>
      %21 = vector.broadcast %20 : vector<1x128xf32> to vector<128x128xf32>
      %22 = arith.addf %19, %21 : vector<128x128xf32>
      %c0_18 = arith.constant 0 : index
      %23 = memref.load %arg2[%c0_18] : memref<1xf32, #tpu.memory_space<smem>>
      %cst_19 = arith.constant 0.000000e+00 : f32
      %24 = vector.broadcast %cst_19 : f32 to vector<128x128xf32>
      %25 = arith.cmpf oge, %22, %24 : vector<128x128xf32>
      %26 = vector.broadcast %23 : f32 to vector<128x128xf32>
      %27 = arith.mulf %26, %22 : vector<128x128xf32>
      %28 = arith.select %25, %22, %27 : vector<128x128xi1>, vector<128x128xf32>
      %c0_20 = arith.constant 0 : index
      %c0_21 = arith.constant 0 : index
      %29 = vector.load %arg8[%c0_20, %c0_21] : memref<128x128xf32, #tpu.memory_space<vmem>>, vector<128x128xf32>
      tpu.vector_store %arg8[%c0_20, %c0_21], %28 {strides = array<i32>} : memref<128x128xf32, #tpu.memory_space<vmem>>, vector<128x128xf32>,
    } else {
    }
    return
  }
  func.func @transform_0(%arg0: i32, %arg1: i32, %arg2: memref<1xf32, #tpu.memory_space<smem>>) -> (i32, i32) {
    %c0_i32 = arith.constant 0 : i32
    return %arg0, %arg1 : i32, i32
  }
  func.func @transform_1(%arg0: i32, %arg1: i32, %arg2: memref<1xf32, #tpu.memory_space<smem>>) -> (i32, i32) {
    %c0_i32 = arith.constant 0 : i32
    %c0_i32_0 = arith.constant 0 : i32
    return %arg1, %c0_i32 : i32, i32
  }
  func.func @transform_2(%arg0: i32, %arg1: i32, %arg2: memref<1xf32, #tpu.memory_space<smem>>) -> (i32, i32) {
    %c0_i32 = arith.constant 0 : i32
    %c0_i32_0 = arith.constant 0 : i32
    %c0_i32_1 = arith.constant 0 : i32
    return %c0_i32, %c0_i32_0 : i32, i32
  }
  func.func @transform_3(%arg0: i32, %arg1: i32, %arg2: memref<1xf32, #tpu.memory_space<smem>>) -> (i32, i32) {
    %c0_i32 = arith.constant 0 : i32
    %c0_i32_0 = arith.constant 0 : i32
    %c0_i32_1 = arith.constant 0 : i32
    return %c0_i32, %c0_i32_0 : i32, i32
  }
  func.func @transform_4(%arg0: i32, %arg1: i32, %arg2: memref<1xf32, #tpu.memory_space<smem>>) -> (i32, i32) {
    %c0_i32 = arith.constant 0 : i32
    %c0_i32_0 = arith.constant 0 : i32
    %c0_i32_1 = arith.constant 0 : i32
    return %c0_i32, %c0_i32_0 : i32, i32
  }
  func.func @transform_5(%arg0: i32, %arg1: i32, %arg2: memref<1xf32, #tpu.memory_space<smem>>) -> (i32, i32) {
    %c0_i32 = arith.constant 0 : i32
    %c0_i32_0 = arith.constant 0 : i32
    return %arg0, %c0_i32 : i32, i32
  }
}

</mosaic_0001>

<bundles_post_ra>
// kernel: tpu_custom_call.1
= control target key start
LH: loop header
LB: loop body
LE: loop exit
PB: predicated region body
PF: predicated region fallthrough
CT: control target
= control target key end

     0   :  { %s1669_s0 = inlined_call_operand.<no memory space> [shape: f32[1], index: 0, kind: input, shape index: {}]   ;;  %s1670_s1 = inlined_call_operand.vmem [shape: bf16[256,256], index: 1, kind: input, shape index: {}]   ;;  %s1671_s2 = inlined_call_operand.vmem [shape: f32[256,32], index: 2, kind: input, shape index: {}]   ;;  %s1672_s3 = inlined_call_operand.vmem [shape: bf16[32,128], index: 3, kind: input, shape index: {}]   ;;  %s1673_s4 = inlined_call_operand.vmem [shape: f32[1,128], index: 4, kind: input, shape index: {}]   ;;  %s1674_s5 = inlined_call_operand.vmem [shape: f32[1,128], index: 5, kind: input, shape index: {}]   ;;  %s1675_s6 = inlined_call_operand.hbm [shape: f32[256,128], index: 6, kind: output, shape index: {}]  }
   0x1   :  { %1677 = sst [smem:[#allocation10_spill]] %s1670_s1 }
   0x2   :  { %11 = sst [smem:[#allocation4]] %s1669_s0 }
   0x3   :  { %12 = vsyncpa [#allocation7], 0 }
   0x4   :  { %14 = vsyncpa [#allocation7 + $0x1], 0  ;;  %s1380_s23 = smov 0   ;;  %s1382_s24 = smov 0  }
   0x5   :  { %s1384_s25 = smov 0   ;;  %s1386_s26 = smov 0  }
   0x6   :  { %s1388_s27 = smov 0   ;;  %s1390_s28 = smov 0  }
   0x7   :  { %s1392_s29 = smov 0   ;;  %s1394_s30 = smov 0  }
   0x8   :  { %s1396_s7 = smov 0   ;;  %s1398_s0 = smov 0  }
   0x9 LB: > { %s992_s8 = sadd.s32 4294967295, %s1336_s0   ;;  %s993_s9 = sadd.s32 4294967294, %s1336_s0   ;;  %s1336_s0 = sphi %s1398_s0, %s20_s0   ;;  %s1332_s7 = sphi %s1396_s7, %s1692_s7   ;;  %s1328_s30 = sphi %s1394_s30, %s1691_s30   ;;  %s1324_s29 = sphi %s1392_s29, %s1690_s29   ;;  %s1320_s28 = sphi %s1390_s28, %s1689_s28   ;;  %s1316_s27 = sphi %s1388_s27, %s1688_s27   ;;  %s1312_s26 = sphi %s1386_s26, %s1687_s26   ;;  %s1308_s25 = sphi %s1384_s25, %s1686_s25   ;;  %s1304_s24 = sphi %s1382_s24, %s1685_s24   ;;  %s1300_s23 = sphi %s1380_s23, %s1684_s23  }
   0xa   : > { %s29_s10 = sadd.s32 1, %s1328_s30  ;;  %s32_s11 = sadd.s32 1, %s1332_s7 }
   0xb   : > { %p30_p0 = scmp.ge.s32.totalorder %s29_s10, 2  ;;  %s41_s12 = sadd.s32 1, %s1316_s27 }
   0xc   : > { %p48_p1 = scmp.ne.s32.totalorder %s1316_s27, %s1312_s26  ;;  %p49_p2 = scmp.eq.s32.totalorder %s1336_s0, 0 }
   0xd   : > { %s1694_s10 = smov (%p30_p0, %s29_s10), 0  ;;  %s1696_s11 = smov (!%p30_p0, %s32_s11), %s1332_s7 }
   0xe   : > { %s37_s13 = ssub.s32 %s1328_s30, %s1694_s10  ;;  %p1443_p3 = por %p49_p2, %p48_p1 }
   0xf   : > { %p34_p4 = scmp.ge.s32.totalorder %s1696_s11, 2  ;;  %s156_s15 = sadd.s32 1, %s1308_s25 }
  0x10   : > { %p166_p5 = scmp.ne.s32.totalorder %s1308_s25, %s1304_s24  ;;  %p167_p6 = scmp.eq.s32.totalorder %s992_s8, 3 }
  0x11   : > { %s1698_s11 = smov (%p34_p4, %s1696_s11), 0  ;;  %p172_p8 = scmp.ne.s32.totalorder %s1304_s24, %s1300_s23 }
  0x12   : > { %1679 = sst [smem:[#allocation9_spill]] %s1698_s11  ;;  %p1452_p7 = por %p167_p6, %p166_p5 }
  0x13   : > { %s36_s17 = ssub.s32 %s1332_s7, %s1698_s11  ;;  %p173_p9 = scmp.eq.s32.totalorder %s993_s9, 3 }
  0x14   : > { %s38_s18 = sor.u32 %s37_s13, %s36_s17  ;;  %p154_p10 = scmp.eq.s32.totalorder %s36_s17, 0 }
  0x15   : > { %p39_p11 = scmp.eq.s32.totalorder %s38_s18, 0  ;;  %p1460_p12 = por %p173_p9, %p172_p8 }
  0x16   : > { %s1465_s20 = scalar_select %p154_p10, %s1308_s25, %s156_s15  }
  0x17   : > { %s1468_s21 = scalar_select %p39_p11, %s1316_s27, %s41_s12  }
  0x18   : > { %p995_p13 = scmp.ge.s32.totalorder %s1336_s0, 4 }
  0x1a   : > { %198 = sbr.rel (%p995_p13) target bundleno = 51 (0x33), region = 28 }
  0x1f   : > { %201 = sbr.rel (!%p1443_p3) target bundleno = 51 (0x33), region = 32  ;;  %s203_s22 = sand.u32 (%p1443_p3), 1, %s1316_s27  }
  0x20   : > { %s1032_s8 = sshll.u32 (%p1443_p3), %s1332_s7, 5  ;;  %s996_s9 = sshll.u32 (%p1443_p3), %s203_s22, 6 }
  0x21   : > { %s208_s13 = sadd.s32 (%p1443_p3), %s1328_s30, %s1032_s8  ;;  %s1682_s1 = sld [smem:[#allocation10_spill]] (%p1443_p3) }
  0x22   : > { %s999_s17 = sshll.u32 (%p1443_p3), %s208_s13, 2  ;;  %s205_s12 = scalar_lea.vmem (%p1443_p3), [#allocation5], %s996_s9 }
  0x27   : > { %s1479_s15 = scalar_lea.vmem %s1682_s1, %s999_s17 }
  0x28   : > { %v227_v0 = vld [vmem:[%s1479_s15] sm:$0xf]  ;;  %v229_v1 = vld [vmem:[%s1479_s15 + $0x8] sm:$0xf]  ;;  %v231_v2 = vld [vmem:[%s1479_s15 + $0x10] sm:$0xf] }
  0x29   : > { %228 = vst [vmem:[%s205_s12] sm:$0xf] %v227_v0  ;;  %230 = vst [vmem:[%s205_s12 + $0x4] sm:$0xf] %v229_v1  ;;  %v233_v3 = vld [vmem:[%s1479_s15 + $0x18] sm:$0xf] }
  0x2a   : > { %232 = vst [vmem:[%s205_s12 + $0x8] sm:$0xf] %v231_v2  ;;  %v235_v4 = vld [vmem:[%s1479_s15 + $0x20] sm:$0xf]  ;;  %v237_v5 = vld [vmem:[%s1479_s15 + $0x28] sm:$0xf] }
  0x2b   : > { %234 = vst [vmem:[%s205_s12 + $0xc] sm:$0xf] %v233_v3  ;;  %236 = vst [vmem:[%s205_s12 + $0x10] sm:$0xf] %v235_v4  ;;  %v239_v6 = vld [vmem:[%s1479_s15 + $0x30] sm:$0xf] }
  0x2c   : > { %238 = vst [vmem:[%s205_s12 + $0x14] sm:$0xf] %v237_v5  ;;  %v241_v7 = vld [vmem:[%s1479_s15 + $0x38] sm:$0xf]  ;;  %v243_v8 = vld [vmem:[%s1479_s15 + $0x40] sm:$0xf] }
  0x2d   : > { %240 = vst [vmem:[%s205_s12 + $0x18] sm:$0xf] %v239_v6  ;;  %242 = vst [vmem:[%s205_s12 + $0x1c] sm:$0xf] %v241_v7  ;;  %v245_v9 = vld [vmem:[%s1479_s15 + $0x48] sm:$0xf] }
  0x2e   : > { %244 = vst [vmem:[%s205_s12 + $0x20] sm:$0xf] %v243_v8  ;;  %v247_v10 = vld [vmem:[%s1479_s15 + $0x50] sm:$0xf]  ;;  %v249_v11 = vld [vmem:[%s1479_s15 + $0x58] sm:$0xf] }
  0x2f   : > { %246 = vst [vmem:[%s205_s12 + $0x24] sm:$0xf] %v245_v9  ;;  %248 = vst [vmem:[%s205_s12 + $0x28] sm:$0xf] %v247_v10  ;;  %v251_v12 = vld [vmem:[%s1479_s15 + $0x60] sm:$0xf] }
  0x30   : > { %250 = vst [vmem:[%s205_s12 + $0x2c] sm:$0xf] %v249_v11  ;;  %v253_v13 = vld [vmem:[%s1479_s15 + $0x68] sm:$0xf]  ;;  %v255_v14 = vld [vmem:[%s1479_s15 + $0x70] sm:$0xf] }
  0x31   : > { %252 = vst [vmem:[%s205_s12 + $0x30] sm:$0xf] %v251_v12  ;;  %254 = vst [vmem:[%s205_s12 + $0x34] sm:$0xf] %v253_v13  ;;  %v257_v15 = vld [vmem:[%s1479_s15 + $0x78] sm:$0xf] }
  0x32   : > { %256 = vst [vmem:[%s205_s12 + $0x38] sm:$0xf] %v255_v14  ;;  %258 = vst [vmem:[%s205_s12 + $0x3c] sm:$0xf] %v257_v15 }
  0x33 PF: > { %p1000_p0 = scmp.ge.s32.totalorder %s1336_s0, 1  ;;  %p322_p1 = scmp.lt.s32.totalorder %s1336_s0, 5 }
  0x35   : > { %p323_p2 = pnand %p1000_p0, %p322_p1 }
  0x36   : > { %s329_s11 = sand.u32 (!%p323_p2), 1, %s1312_s26   ;;  %s358_s14 = sand.u32 (!%p323_p2), 1, %s1304_s24  }
  0x37   : > { %326 = sbr.rel (%p323_p2) target bundleno = 602 (0x25a), region = 77  ;;  %s1001_s22 = sshll.u32 (!%p323_p2), %s329_s11, 6 }
  0x38   : > { %s1002_s8 = sshll.u32 (!%p323_p2), %s358_s14, 7  ;;  %s1003_s9 = sshll.u32 (!%p323_p2), %s1320_s28, 4 }
  0x39   : > { %p363_p3 = scmp.lt.s32.totalorder (!%p323_p2), %s1003_s9, 31  ;;  %s1509_s12 = scalar_lea.vmem (!%p323_p2), [#allocation5], %s1001_s22 }
  0x3a   : > { %s1511_s1 = scalar_lea.vmem (!%p323_p2), [#allocation6], %s1002_s8  ;;  %p1005_p4 = scmp.ne.s32.totalorder (!%p323_p2), %s1320_s28, 0 }
  0x3c   : > { %s1700_s9 = smov (!%p363_p3, %s1003_s9), 31  ;;  %373 = sbr.rel (%p1005_p4) target bundleno = 74 (0x4a), region = 85 }
  0x3d   : > { %s1004_s13 = sshll.u32 %s1700_s9, 3 }
  0x3e   : > { %s1507_s15 = scalar_lea.vmem %s1671_s2, %s1004_s13 }
  0x41   : > { %v1338_v16 = vmov 0.0  }
  0x42   : > { %374 = vst [vmem:[#allocation2 + $0x30] sm:$0xff] %v1338_v16  ;;  %375 = vst [vmem:[#allocation2] sm:$0xff] %v1338_v16 }
  0x43   : > { %376 = vst [vmem:[#allocation2 + $0x58] sm:$0xff] %v1338_v16  ;;  %377 = vst [vmem:[#allocation2 + $0x18] sm:$0xff] %v1338_v16 }
  0x44   : > { %378 = vst [vmem:[#allocation2 + $0x50] sm:$0xff] %v1338_v16  ;;  %379 = vst [vmem:[#allocation2 + $0x68] sm:$0xff] %v1338_v16 }
  0x45   : > { %380 = vst [vmem:[#allocation2 + $0x8] sm:$0xff] %v1338_v16  ;;  %381 = vst [vmem:[#allocation2 + $0x48] sm:$0xff] %v1338_v16 }
  0x46   : > { %382 = vst [vmem:[#allocation2 + $0x40] sm:$0xff] %v1338_v16  ;;  %383 = vst [vmem:[#allocation2 + $0x20] sm:$0xff] %v1338_v16 }
  0x47   : > { %384 = vst [vmem:[#allocation2 + $0x10] sm:$0xff] %v1338_v16  ;;  %385 = vst [vmem:[#allocation2 + $0x38] sm:$0xff] %v1338_v16 }
  0x48   : > { %386 = vst [vmem:[#allocation2 + $0x60] sm:$0xff] %v1338_v16  ;;  %387 = vst [vmem:[#allocation2 + $0x70] sm:$0xff] %v1338_v16 }
  0x49   : > { %388 = vst [vmem:[#allocation2 + $0x78] sm:$0xff] %v1338_v16  ;;  %389 = vst [vmem:[#allocation2 + $0x28] sm:$0xff] %v1338_v16 }
  0x4a PF: > { %v1218_v17 = vld [vmem:[%s1672_s3 + $0x8] sm:$0xff]   ;;  %v1219_v18 = vld [vmem:[%s1672_s3] sm:$0xff]   ;;  %vm437_vm0 = vcmask 261120   ;;  %v392_v22 = vld [vmem:[%s1507_s15 + $0x10] sm:$0xff]  ;;  %p1025_p5 = scmp.ne.s32.totalorder %s1320_s28, 1 }
  0x4b   : > { %1060 = vmatprep.subr.bf16.mxu0 %v1218_v17  ;;  %v390_v19 = vld [vmem:[%s1507_s15] sm:$0xff]  ;;  %v391_v20 = vld [vmem:[%s1507_s15 + $0x8] sm:$0xff]  ;;  %v393_v23 = vld [vmem:[%s1507_s15 + $0x18] sm:$0xff] }
  0x4c   : > { %1061 = vmatpush3.bf16.msra.mxu0 %v1218_v17  ;;  %v406_v21 = vpack.c.bf16 %v391_v20, %v390_v19  ;;  %v394_v24 = vld [vmem:[%s1507_s15 + $0x20] sm:$0xff]  ;;  %v395_v25 = vld [vmem:[%s1507_s15 + $0x28] sm:$0xff]  ;;  %v407_v26 = vpack.c.bf16 %v393_v23, %v392_v22  ;;  %v396_v28 = vld [vmem:[%s1507_s15 + $0x30] sm:$0xff] }
  0x4d   : > { %1062 = vmatprep.subr.bf16.mxu0 %v1219_v18  ;;  %v408_v27 = vpack.c.bf16 %v395_v25, %v394_v24  ;;  %v397_v29 = vld [vmem:[%s1507_s15 + $0x38] sm:$0xff]  ;;  %v398_v30 = vld [vmem:[%s1507_s15 + $0x40] sm:$0xff]  ;;  %v399_v31 = vld [vmem:[%s1507_s15 + $0x48] sm:$0xff] }
  0x4e   : > { %1064 = vmatprep.mubr.msk.bf16.mxu0 %vm437_vm0, %v406_v21  ;;  %v409_v32 = vpack.c.bf16 %v397_v29, %v396_v28  ;;  %v410_v33 = vpack.c.bf16 %v399_v31, %v398_v30  ;;  %v400_v34 = vld [vmem:[%s1507_s15 + $0x50] sm:$0xff]  ;;  %v401_v35 = vld [vmem:[%s1507_s15 + $0x58] sm:$0xff]  ;;  %v402_v36 = vld [vmem:[%s1507_s15 + $0x60] sm:$0xff] }
  0x4f   : > { %v403_v37 = vld [vmem:[%s1507_s15 + $0x68] sm:$0xff]  ;;  %v411_v38 = vpack.c.bf16 %v401_v35, %v400_v34  ;;  %v404_v40 = vld [vmem:[%s1507_s15 + $0x70] sm:$0xff]  ;;  %v405_v41 = vld [vmem:[%s1507_s15 + $0x78] sm:$0xff]  ;;  %s819_s15 = sld [smem:[#allocation4]] (!%p1025_p5) }
  0x50   : > { %1063 = vmatpush3.bf16.msra.mxu0 %v1219_v18  ;;  %v412_v39 = vpack.c.bf16 %v403_v37, %v402_v36  ;;  %v413_v42 = vpack.c.bf16 %v405_v41, %v404_v40  ;;  %v1220_v43 = vld [vmem:[%s1509_s12 + $0x10] sm:$0xff]   ;;  %v1224_v44 = vld [vmem:[%s1509_s12] sm:$0xff]   ;;  %v1221_v22 = vld [vmem:[%s1509_s12 + $0x18] sm:$0xff]  }
  0x51   : > { %1100 = vmatprep.mubr.bf16.mxu1 %v1220_v43  ;;  %v1006_v59 = vld [vmem:[%s1673_s4] ss:$0 sm:$0xff]  ;;  %v1225_v23 = vld [vmem:[%s1509_s12 + $0x8] sm:$0xff]   ;;  %v561_v29 = vld [vmem:[#allocation2 + $0x58] sm:$0xff] }
  0x52   : > { %v1222_v24 = vld [vmem:[%s1509_s12 + $0x20] sm:$0xff]   ;;  %v1223_v25 = vld [vmem:[%s1509_s12 + $0x28] sm:$0xff]   ;;  %v563_v31 = vld [vmem:[#allocation2 + $0x50] sm:$0xff] }
  0x53   : > { %1065 = vmatmul.mubr.msk.bf16.vlgmr.msra.gmra.mxu0 %vm437_vm0, %v407_v26  ;;  %v1226_v26 = vld [vmem:[%s1509_s12 + $0x30] sm:$0xff]   ;;  %v565_v28 = vld [vmem:[#allocation2 + $0x8] sm:$0xff] }
  0x54   : > { %1068 = vmatprep.mubr.msk.bf16.mxu0 %vm437_vm0, %v408_v27  ;;  %v1227_v27 = vld [vmem:[%s1509_s12 + $0x38] sm:$0xff]   ;;  %v566_v37 = vld [vmem:[#allocation2 + $0x48] sm:$0xff] }
  0x55   : > { %v564_v43 = vld [vmem:[#allocation2 + $0x68] sm:$0xff] }
  0x5b   : > { %1069 = vmatmul.mubr.msk.bf16.gmra.mxu0 %vm437_vm0, %v409_v32 }
  0x5c   : > { %1072 = vmatprep.mubr.msk.bf16.mxu0 %vm437_vm0, %v410_v33  ;;  %v559_v33 = vld [vmem:[#allocation2 + $0x30] sm:$0xff] }
  0x63   : > { %1073 = vmatmul.mubr.msk.bf16.gmra.mxu0 %vm437_vm0, %v411_v38 }
  0x64   : > { %1076 = vmatprep.mubr.msk.bf16.mxu0 %vm437_vm0, %v412_v39  ;;  %v562_v39 = vld [vmem:[#allocation2 + $0x18] sm:$0xff] }
  0x6b   : > { %1077 = vmatmul.mubr.msk.bf16.gmra.mxu0 %vm437_vm0, %v413_v42 }
  0x6c   : > { %1096 = vmatprep.mubr.bf16.mxu0 %v1224_v44 }
 0x113   : > { %v1066_v45 = vpop.f32.mrf.mxu0 }
 0x114   : > { %v505_v17 = vadd.f32 %v1066_v45, %v1006_v59  ;;  %v560_v45 = vld [vmem:[#allocation2] sm:$0xff] }
 0x115   : > { %v496_v46 = vpop.f32.mrf.mxu0 }
 0x116   : > { %v497_v20 = vadd.f32 %v1006_v59, %v496_v46 }
 0x117   : > { %v1067_v47 = vpop.f32.mrf.mxu0 }
 0x118   : > { %v508_v15 = vadd.f32 %v1067_v47, %v1006_v59 }
 0x119   : > { %v499_v48 = vpop.f32.mrf.mxu0 }
 0x11a   : > { %v592_v18 = vpack.c.bf16 %v508_v15, %v505_v17  ;;  %v500_v19 = vadd.f32 %v1006_v59, %v499_v48 }
 0x11b   : > { %v1070_v49 = vpop.f32.mrf.mxu0 }
 0x11c   : > { %v521_v11 = vadd.f32 %v1070_v49, %v1006_v59  ;;  %v591_v21 = vpack.c.bf16 %v500_v19, %v497_v20  ;;  %v569_v49 = vld [vmem:[#allocation2 + $0x10] sm:$0xff] }
 0x11d   : > { %v512_v50 = vpop.f32.mrf.mxu0 }
 0x11e   : > { %v513_v14 = vadd.f32 %v1006_v59, %v512_v50 }
 0x11f   : > { %v1071_v51 = vpop.f32.mrf.mxu0 }
 0x120   : > { %v524_v9 = vadd.f32 %v1071_v51, %v1006_v59 }
 0x121   : > { %v515_v52 = vpop.f32.mrf.mxu0 }
 0x122   : > { %v594_v12 = vpack.c.bf16 %v524_v9, %v521_v11  ;;  %v516_v13 = vadd.f32 %v1006_v59, %v515_v52 }
 0x123   : > { %v1074_v53 = vpop.f32.mrf.mxu0 }
 0x124   : > { %v537_v5 = vadd.f32 %v1074_v53, %v1006_v59  ;;  %v593_v16 = vpack.c.bf16 %v516_v13, %v513_v14 }
 0x125   : > { %v528_v54 = vpop.f32.mrf.mxu0 }
 0x126   : > { %v529_v8 = vadd.f32 %v1006_v59, %v528_v54  ;;  %v567_v54 = vld [vmem:[#allocation2 + $0x40] sm:$0xff] }
 0x127   : > { %v1075_v55 = vpop.f32.mrf.mxu0 }
 0x128   : > { %v540_v3 = vadd.f32 %v1075_v55, %v1006_v59 }
 0x129   : > { %v531_v56 = vpop.f32.mrf.mxu0 }
 0x12a   : > { %v596_v6 = vpack.c.bf16 %v540_v3, %v537_v5  ;;  %v532_v7 = vadd.f32 %v1006_v59, %v531_v56  ;;  %v574_v5 = vld [vmem:[#allocation2 + $0x28] sm:$0xff] }
 0x12b   : > { %v1078_v57 = vpop.f32.mrf.mxu0 }
 0x12c   : > { %v553_v61 = vadd.f32 %v1078_v57, %v1006_v59  ;;  %v595_v10 = vpack.c.bf16 %v532_v7, %v529_v8  ;;  %v570_v57 = vld [vmem:[#allocation2 + $0x38] sm:$0xff]  ;;  %v572_v8 = vld [vmem:[#allocation2 + $0x70] sm:$0xff] }
 0x12d   : > { %v544_v58 = vpop.f32.mrf.mxu0 }
 0x12e   : > { %v545_v0 = vadd.f32 %v1006_v59, %v544_v58 }
 0x12f   : > { %v1079_v60 = vpop.f32.mrf.mxu0 }
 0x130   : > { %v556_v62 = vadd.f32 %v1079_v60, %v1006_v59  ;;  %v568_v60 = vld [vmem:[#allocation2 + $0x20] sm:$0xff] }
 0x131   : > { %v547_v63 = vpop.f32.mrf.mxu0 }
 0x132   : > { %v598_v1 = vpack.c.bf16 %v556_v62, %v553_v61  ;;  %v548_v2 = vadd.f32 %v1006_v59, %v547_v63  ;;  %v573_v63 = vld [vmem:[#allocation2 + $0x78] sm:$0xff] }
 0x134   : > { %v597_v4 = vpack.c.bf16 %v548_v2, %v545_v0  ;;  %1080 = vmatprep.subr.bf16.mxu0 %v598_v1  ;;  %1112 = vmatprep.subr.bf16.mxu1 %v598_v1  ;;  %v571_v2 = vld [vmem:[#allocation2 + $0x60] sm:$0xff] }
 0x135   : > { %1081 = vmatpush3.bf16.msra.mxu0 %v598_v1  ;;  %1120 = vmatpush3.bf16.msra.mxu1 %v598_v1 }
 0x136   : > { %1082 = vmatprep.subr.bf16.mxu0 %v597_v4  ;;  %1113 = vmatprep.subr.bf16.mxu1 %v597_v4 }
 0x139   : > { %1083 = vmatpush3.bf16.msra.mxu0 %v597_v4  ;;  %1121 = vmatpush3.bf16.msra.mxu1 %v597_v4 }
 0x13a   : > { %1084 = vmatprep.subr.bf16.mxu0 %v596_v6  ;;  %1114 = vmatprep.subr.bf16.mxu1 %v596_v6 }
 0x13d   : > { %1085 = vmatpush3.bf16.msra.mxu0 %v596_v6  ;;  %1122 = vmatpush3.bf16.msra.mxu1 %v596_v6 }
 0x13e   : > { %1086 = vmatprep.subr.bf16.mxu0 %v595_v10  ;;  %1115 = vmatprep.subr.bf16.mxu1 %v595_v10 }
 0x141   : > { %1087 = vmatpush3.bf16.msra.mxu0 %v595_v10  ;;  %1123 = vmatpush3.bf16.msra.mxu1 %v595_v10 }
 0x142   : > { %1088 = vmatprep.subr.bf16.mxu0 %v594_v12  ;;  %1116 = vmatprep.subr.bf16.mxu1 %v594_v12 }
 0x145   : > { %1089 = vmatpush3.bf16.msra.mxu0 %v594_v12  ;;  %1124 = vmatpush3.bf16.msra.mxu1 %v594_v12 }
 0x146   : > { %1090 = vmatprep.subr.bf16.mxu0 %v593_v16  ;;  %1117 = vmatprep.subr.bf16.mxu1 %v593_v16 }
 0x149   : > { %1091 = vmatpush3.bf16.msra.mxu0 %v593_v16  ;;  %1125 = vmatpush3.bf16.msra.mxu1 %v593_v16 }
 0x14a   : > { %1092 = vmatprep.subr.bf16.mxu0 %v592_v18  ;;  %1118 = vmatprep.subr.bf16.mxu1 %v592_v18 }
 0x14d   : > { %1093 = vmatpush3.bf16.msra.mxu0 %v592_v18  ;;  %1126 = vmatpush3.bf16.msra.mxu1 %v592_v18 }
 0x14e   : > { %1094 = vmatprep.subr.bf16.mxu0 %v591_v21  ;;  %1119 = vmatprep.subr.bf16.mxu1 %v591_v21 }
 0x151   : > { %1095 = vmatpush3.bf16.msra.mxu0 %v591_v21  ;;  %1127 = vmatpush3.bf16.msra.mxu1 %v591_v21 }
 0x154   : > { %1101 = vmatmul.mubr.bf16.vlgmr.msra.gmra.mxu1 %v1221_v22  ;;  %1097 = vmatmul.mubr.bf16.vlgmr.msra.gmra.mxu0 %v1225_v23 }
 0x155   : > { %1104 = vmatprep.mubr.bf16.mxu1 %v1222_v24 }
 0x15c   : > { %1105 = vmatmul.mubr.bf16.gmra.mxu1 %v1223_v25 }
 0x15d   : > { %1108 = vmatprep.mubr.bf16.mxu1 %v1226_v26 }
 0x164   : > { %1109 = vmatmul.mubr.bf16.gmra.mxu1 %v1227_v27 }
 0x214   : > { %v1102_v30 = vpop.f32.mrf.mxu1  ;;  %v1098_v32 = vpop.f32.mrf.mxu0 }
 0x215   : > { %v750_v34 = vadd.f32 %v1102_v30, %v565_v28  ;;  %v746_v35 = vadd.f32 %v1098_v32, %v561_v29 }
 0x216   : > { %v697_v36 = vpop.f32.mrf.mxu1  ;;  %v681_v38 = vpop.f32.mrf.mxu0 }
 0x217   : > { %766 = vst [vmem:[#allocation2 + $0x8] sm:$0xff] %v750_v34  ;;  %v748_v40 = vadd.f32 %v697_v36, %v563_v31  ;;  %762 = vst [vmem:[#allocation2 + $0x58] sm:$0xff] %v746_v35  ;;  %v744_v41 = vadd.f32 %v681_v38, %v559_v33 }
 0x218   : > { %v1103_v42 = vpop.f32.mrf.mxu1  ;;  %v1099_v44 = vpop.f32.mrf.mxu0 }
 0x219   : > { %764 = vst [vmem:[#allocation2 + $0x50] sm:$0xff] %v748_v40  ;;  %v751_v46 = vadd.f32 %v1103_v42, %v566_v37  ;;  %760 = vst [vmem:[#allocation2 + $0x30] sm:$0xff] %v744_v41  ;;  %v747_v47 = vadd.f32 %v1099_v44, %v562_v39 }
 0x21a   : > { %v700_v48 = vpop.f32.mrf.mxu1  ;;  %v684_v50 = vpop.f32.mrf.mxu0 }
 0x21b   : > { %767 = vst [vmem:[#allocation2 + $0x48] sm:$0xff] %v751_v46  ;;  %v749_v51 = vadd.f32 %v700_v48, %v564_v43  ;;  %763 = vst [vmem:[#allocation2 + $0x18] sm:$0xff] %v747_v47  ;;  %v745_v52 = vadd.f32 %v684_v50, %v560_v45 }
 0x21c   : > { %v1106_v53 = vpop.f32.mrf.mxu1 }
 0x21d   : > { %765 = vst [vmem:[#allocation2 + $0x68] sm:$0xff] %v749_v51  ;;  %v754_v55 = vadd.f32 %v1106_v53, %v569_v49  ;;  %761 = vst [vmem:[#allocation2] sm:$0xff] %v745_v52 }
 0x21e   : > { %v713_v56 = vpop.f32.mrf.mxu1 }
 0x21f   : > { %770 = vst [vmem:[#allocation2 + $0x10] sm:$0xff] %v754_v55  ;;  %v752_v58 = vadd.f32 %v713_v56, %v567_v54 }
 0x220   : > { %v1107_v59 = vpop.f32.mrf.mxu1 }
 0x221   : > { %768 = vst [vmem:[#allocation2 + $0x40] sm:$0xff] %v752_v58  ;;  %v755_v61 = vadd.f32 %v1107_v59, %v570_v57 }
 0x222   : > { %v716_v62 = vpop.f32.mrf.mxu1 }
 0x223   : > { %771 = vst [vmem:[#allocation2 + $0x38] sm:$0xff] %v755_v61  ;;  %v753_v0 = vadd.f32 %v716_v62, %v568_v60 }
 0x224   : > { %v1110_v1 = vpop.f32.mrf.mxu1 }
 0x225   : > { %769 = vst [vmem:[#allocation2 + $0x20] sm:$0xff] %v753_v0  ;;  %v758_v3 = vadd.f32 %v1110_v1, %v573_v63 }
 0x226   : > { %v729_v4 = vpop.f32.mrf.mxu1 }
 0x227   : > { %774 = vst [vmem:[#allocation2 + $0x78] sm:$0xff] %v758_v3  ;;  %v756_v6 = vadd.f32 %v729_v4, %v571_v2 }
 0x228   : > { %v1111_v7 = vpop.f32.mrf.mxu1 }
 0x229   : > { %772 = vst [vmem:[#allocation2 + $0x60] sm:$0xff] %v756_v6  ;;  %v759_v9 = vadd.f32 %v1111_v7, %v574_v5  ;;  %779 = sbr.rel (%p1025_p5) target bundleno = 578 (0x242), region = 89 }
 0x22a   : > { %v732_v10 = vpop.f32.mrf.mxu1 }
 0x22b   : > { %775 = vst [vmem:[#allocation2 + $0x28] sm:$0xff] %v759_v9  ;;  %v757_v11 = vadd.f32 %v732_v10, %v572_v8 }
 0x22d   : > { %773 = vst [vmem:[#allocation2 + $0x70] sm:$0xff] %v757_v11 }
 0x22e   : > { %v780_v12 = vld [vmem:[#allocation2 + $0x30] sm:$0xff]  ;;  %v1559_v13 = vld [vmem:[%s1674_s5] ss:$0 sm:$0xff]  ;;  %v782_v17 = vld [vmem:[#allocation2 + $0x58] sm:$0xff]  ;;  %v836_v35 = vstv %s819_s15 }
 0x22f   : > { %v781_v14 = vld [vmem:[#allocation2] sm:$0xff]  ;;  %v803_v15 = vadd.f32 %v1559_v13, %v780_v12  ;;  %v783_v18 = vld [vmem:[#allocation2 + $0x18] sm:$0xff]  ;;  %v784_v19 = vld [vmem:[#allocation2 + $0x50] sm:$0xff]  ;;  %v805_v20 = vadd.f32 %v1559_v13, %v782_v17 }
 0x230   : > { %v804_v16 = vadd.f32 %v1559_v13, %v781_v14  ;;  %v806_v21 = vadd.f32 %v1559_v13, %v783_v18  ;;  %v807_v22 = vadd.f32 %v1559_v13, %v784_v19  ;;  %v785_v23 = vld [vmem:[#allocation2 + $0x68] sm:$0xff]  ;;  %v788_v28 = vld [vmem:[#allocation2 + $0x40] sm:$0xff]  ;;  %v790_v30 = vld [vmem:[#allocation2 + $0x10] sm:$0xff] }
 0x231   : > { %v786_v24 = vld [vmem:[#allocation2 + $0x8] sm:$0xff]  ;;  %vm820_vm1 = vcmp.ge.f32.partialorder %v803_v15, 0.0  ;;  %v808_v26 = vadd.f32 %v1559_v13, %v785_v23  ;;  %v789_v29 = vld [vmem:[#allocation2 + $0x20] sm:$0xff]  ;;  %vm822_vm3 = vcmp.ge.f32.partialorder %v805_v20, 0.0  ;;  %v791_v32 = vld [vmem:[#allocation2 + $0x38] sm:$0xff]  ;;  %v811_v33 = vadd.f32 %v1559_v13, %v788_v28 }
 0x232   : > { %v787_v25 = vld [vmem:[#allocation2 + $0x48] sm:$0xff]  ;;  %vm821_vm2 = vcmp.ge.f32.partialorder %v804_v16, 0.0  ;;  %v809_v27 = vadd.f32 %v1559_v13, %v786_v24  ;;  %vm823_vm4 = vcmp.ge.f32.partialorder %v806_v21, 0.0  ;;  %vm824_vm5 = vcmp.ge.f32.partialorder %v807_v22, 0.0  ;;  %v792_v54 = vld [vmem:[#allocation2 + $0x60] sm:$0xff]  ;;  %v794_v58 = vld [vmem:[#allocation2 + $0x78] sm:$0xff] }
 0x233   : > { %v810_v31 = vadd.f32 %v1559_v13, %v787_v25  ;;  %vm825_vm6 = vcmp.ge.f32.partialorder %v808_v26, 0.0  ;;  %v812_v34 = vadd.f32 %v1559_v13, %v789_v29  ;;  %v813_v36 = vadd.f32 %v1559_v13, %v790_v30  ;;  %v795_v59 = vld [vmem:[#allocation2 + $0x28] sm:$0xff] }
 0x234   : > { %vm826_vm7 = vcmp.ge.f32.partialorder %v809_v27, 0.0  ;;  %v814_v37 = vadd.f32 %v1559_v13, %v791_v32  ;;  %v837_v38 = vmul.f32 %v836_v35, %v803_v15  ;;  %v838_v39 = vmul.f32 %v836_v35, %v804_v16  ;;  %v793_v55 = vld [vmem:[#allocation2 + $0x70] sm:$0xff] }
 0x235   : > { %vm827_vm8 = vcmp.ge.f32.partialorder %v810_v31, 0.0  ;;  %v839_v40 = vmul.f32 %v836_v35, %v805_v20  ;;  %v840_v41 = vmul.f32 %v836_v35, %v806_v21  ;;  %v841_v42 = vmul.f32 %v836_v35, %v807_v22 }
 0x236   : > { %v842_v43 = vmul.f32 %v836_v35, %v808_v26  ;;  %v843_v44 = vmul.f32 %v836_v35, %v809_v27  ;;  %v844_v45 = vmul.f32 %v836_v35, %v810_v31  ;;  %v853_v46 = vsel %vm820_vm1, %v803_v15, %v837_v38 }
 0x237   : > { %v854_v47 = vsel %vm821_vm2, %v804_v16, %v838_v39  ;;  %v855_v48 = vsel %vm822_vm3, %v805_v20, %v839_v40  ;;  %v856_v49 = vsel %vm823_vm4, %v806_v21, %v840_v41  ;;  %869 = vst [vmem:[%s1511_s1] sm:$0xff] %v853_v46  ;;  %v857_v50 = vsel %vm824_vm5, %v807_v22, %v841_v42 }
 0x238   : > { %870 = vst [vmem:[%s1511_s1 + $0x8] sm:$0xff] %v854_v47  ;;  %871 = vst [vmem:[%s1511_s1 + $0x10] sm:$0xff] %v855_v48  ;;  %v858_v51 = vsel %vm825_vm6, %v808_v26, %v842_v43  ;;  %v859_v52 = vsel %vm826_vm7, %v809_v27, %v843_v44  ;;  %v860_v53 = vsel %vm827_vm8, %v810_v31, %v844_v45  ;;  %vm828_vm9 = vcmp.ge.f32.partialorder %v811_v33, 0.0 }
 0x239   : > { %872 = vst [vmem:[%s1511_s1 + $0x18] sm:$0xff] %v856_v49  ;;  %873 = vst [vmem:[%s1511_s1 + $0x20] sm:$0xff] %v857_v50  ;;  %v845_v56 = vmul.f32 %v836_v35, %v811_v33  ;;  %vm829_vm10 = vcmp.ge.f32.partialorder %v812_v34, 0.0  ;;  %v846_v57 = vmul.f32 %v836_v35, %v812_v34  ;;  %vm830_vm11 = vcmp.ge.f32.partialorder %v813_v36, 0.0 }
 0x23a   : > { %874 = vst [vmem:[%s1511_s1 + $0x28] sm:$0xff] %v858_v51  ;;  %875 = vst [vmem:[%s1511_s1 + $0x30] sm:$0xff] %v859_v52  ;;  %v847_v60 = vmul.f32 %v836_v35, %v813_v36  ;;  %vm831_vm12 = vcmp.ge.f32.partialorder %v814_v37, 0.0  ;;  %v848_v61 = vmul.f32 %v836_v35, %v814_v37  ;;  %v815_v0 = vadd.f32 %v1559_v13, %v792_v54 }
 0x23b   : > { %876 = vst [vmem:[%s1511_s1 + $0x38] sm:$0xff] %v860_v53  ;;  %v861_v62 = vsel %vm828_vm9, %v811_v33, %v845_v56  ;;  %v862_v63 = vsel %vm829_vm10, %v812_v34, %v846_v57  ;;  %v816_v1 = vadd.f32 %v1559_v13, %v793_v55  ;;  %v817_v4 = vadd.f32 %v1559_v13, %v794_v58 }
 0x23c   : > { %877 = vst [vmem:[%s1511_s1 + $0x40] sm:$0xff] %v861_v62  ;;  %878 = vst [vmem:[%s1511_s1 + $0x48] sm:$0xff] %v862_v63  ;;  %v863_v2 = vsel %vm830_vm11, %v813_v36, %v847_v60  ;;  %v864_v3 = vsel %vm831_vm12, %v814_v37, %v848_v61  ;;  %v818_v5 = vadd.f32 %v1559_v13, %v795_v59  ;;  %vm832_vm13 = vcmp.ge.f32.partialorder %v815_v0, 0.0 }
 0x23d   : > { %879 = vst [vmem:[%s1511_s1 + $0x50] sm:$0xff] %v863_v2  ;;  %880 = vst [vmem:[%s1511_s1 + $0x58] sm:$0xff] %v864_v3  ;;  %v849_v6 = vmul.f32 %v836_v35, %v815_v0  ;;  %vm833_vm14 = vcmp.ge.f32.partialorder %v816_v1, 0.0  ;;  %v850_v7 = vmul.f32 %v836_v35, %v816_v1  ;;  %vm834_vm15 = vcmp.ge.f32.partialorder %v817_v4, 0.0 }
 0x23e   : > { %v851_v8 = vmul.f32 %v836_v35, %v817_v4  ;;  %vm835_vm0 = vcmp.ge.f32.partialorder %v818_v5, 0.0  ;;  %v852_v9 = vmul.f32 %v836_v35, %v818_v5 }
 0x23f   : > { %v865_v10 = vsel %vm832_vm13, %v815_v0, %v849_v6  ;;  %v866_v11 = vsel %vm833_vm14, %v816_v1, %v850_v7 }
 0x240   : > { %881 = vst [vmem:[%s1511_s1 + $0x60] sm:$0xff] %v865_v10  ;;  %882 = vst [vmem:[%s1511_s1 + $0x68] sm:$0xff] %v866_v11  ;;  %v867_v12 = vsel %vm834_vm15, %v817_v4, %v851_v8  ;;  %v868_v14 = vsel %vm835_vm0, %v818_v5, %v852_v9 }
 0x241   : > { %883 = vst [vmem:[%s1511_s1 + $0x70] sm:$0xff] %v867_v12  ;;  %884 = vst [vmem:[%s1511_s1 + $0x78] sm:$0xff] %v868_v14 }
 0x242 PF: > { %s1033_s28 = sshll.u32 %s1324_s29, 11  ;;  %s899_s22 = sshll.u32 %s1511_s1, 4  ;;  %s1608_s22 = int_to_ptr.vmem [resolvable:$true] %s899_s22 }
 0x243   : > { %s1605_s11 = scalar_lea.hbm %s1675_s6, %s1033_s28  ;;  %s1612_s8 = scalar_lea.sflag [#allocation7], %s358_s14 }
 0x244   : > { %s1228_s9 = scalar_lea.vmem %s1608_s22, 2048  ;;  %s1339_s29 = smov [#allocation6]  }
 0x245   : > { %p1229_p6 = scmp.ne.s32.totalorder %s1608_s22, %s1228_s9  ;;  %s1232_s13 = sshll.u32 %s1339_s29, 4  ;;  %s1233_s13 = int_to_ptr.vmem [resolvable:$false] %s1232_s13 }
 0x246   : > { %s1234_s17 = scalar_lea.vmem %s1233_s13, 4096  ;;  %p1235_p10 = scmp.lt.s32.totalorder %s1608_s22, %s1233_s13 }
 0x247   : > { %p1230_p8 = pnand %p1229_p6, %p1452_p7  ;;  %p1236_p11 = scmp.lt.s32.totalorder %s1234_s17, %s1228_s9 }
 0x249   : > { %p1231_p9 = pneg %p1230_p8  ;;  %p1237_p13 = por %p1236_p11, %p1235_p10 }
 0x24b   : > { %p1238_p0 = pnand %p1237_p13, %p1231_p9 }
 0x24d   : > { %1241 = shalt.err (!%p1238_p0)
}
 0x24e   : > { %s1242_s1 = scalar_lea.hbm %s1605_s11, 2048  ;;  %s1246_s15 = scalar_lea.hbm %s1675_s6, 4096 }
 0x24f   : > { %p1243_p1 = scmp.ne.s32.totalorder %s1605_s11, %s1242_s1  ;;  %p1247_p4 = scmp.lt.s32.totalorder %s1605_s11, %s1675_s6 }
 0x250   : > { %p1248_p5 = scmp.lt.s32.totalorder %s1246_s15, %s1242_s1 }
 0x251   : > { %p1244_p2 = pnand %p1243_p1, %p1452_p7 }
 0x252   : > { %p1249_p6 = por %p1248_p5, %p1247_p4 }
 0x253   : > { %p1245_p3 = pneg %p1244_p2 }
 0x255   : > { %p1250_p8 = pnand %p1249_p6, %p1245_p3 }
 0x257   : > { %1253 = shalt.err (!%p1250_p8)
}
 0x258   : > { %s1340_s26 = smov 128   ;;  %s1341_s9 = smov 8  }
 0x259   : > { %1128 = dma.vmem_to_hbm [thread:$0]  (%p1452_p7), %s1608_s22, 2048, %s1605_s11, %s1612_s8, %s1340_s26, %s1340_s26, %s1341_s9  }
 0x25a PF: > { %p1134_p9 = scmp.ge.s32.totalorder %s1336_s0, 2  ;;  %s914_s29 = sand.u32 1, %s1300_s23  }
 0x25b   : > { %s915_s13 = scalar_lea.sflag [#allocation7], %s914_s29 }
 0x25c   : > { %p1131_p10 = pnand %p1134_p9, %p1460_p12 }
 0x25e   : > { %p1132_p11 = pneg %p1131_p10 }
 0x260   : > { %1295 = dma.done.wait (%p1132_p11), %s915_s13, 2048  }
 0x261   : > { %1297 = vsyncadd (%p1132_p11), %s915_s13, 4294965248  ;;  %s20_s0 = sadd.s32 1, %s1336_s0   ;;  %s1683_s16 = sld [smem:[#allocation9_spill]] }
 0x262   : > { %p17_p13 = scmp.ge.s32.totalorder %s20_s0, 6   ;;  %s1684_s23 = smov %s1304_s24 }
 0x263   : > { %s1685_s24 = smov %s1308_s25  ;;  %s1686_s25 = smov %s1465_s20 }
 0x264   : > { %s1687_s26 = smov %s1316_s27  ;;  %s1688_s27 = smov %s1468_s21 }
 0x265   : > { %s1689_s28 = smov %s1328_s30  ;;  %s1690_s29 = smov %s1332_s7 }
 0x266   : > { %s1691_s30 = smov %s1694_s10  ;;  %19 = sbr.rel (!%p17_p13) target bundleno = 9 (0x9), region = 132 }
 0x267   : > { %s1692_s7 = smov %s1683_s16 }
 0x26b   :  { %920 = vsyncpa [#allocation7], 1 }
 0x26c   :  { %922 = vsyncpa [#allocation7 + $0x1], 1 }

</bundles_post_ra>
